<compile_context>
chip_gen: v7x
topology: tpu7x:2x2x1
jax: 0.10.0
libtpu: 0.0.40
codegen_flags: <defaults>
</compile_context>

<pallas_src>
import functools

import jax
import jax.numpy as jnp
from jax.experimental import pallas as pl
from jax.experimental.pallas import tpu as pltpu


# ----------------------------------------------------------------------------
# Kernels
# ----------------------------------------------------------------------------
def _huber(logits, labels, delta):
    """Branch-free Huber: 0.5*r^2 if |r|<=delta else delta*(|r|-0.5*delta)."""
    r = logits.astype(jnp.float32) - labels.astype(jnp.float32)
    a = jnp.abs(r)
    c = jnp.minimum(a, jnp.float32(delta))
    return c * (a - 0.5 * c)


def _accumulate_psum(loss_tile, psum_ref):
    """Accumulate a (tb, tn) f32 tile into an (1, 8, tn) resident accumulator.

    Free reshape groups 8-row vreg tiles; the axis-0 sum is elementwise vreg
    adds on the VPU — no cross-lane XLU reduce and no masked sub-128 stores in
    the inner loop.
    """
    tb, tn = loss_tile.shape
    psum_ref[...] += jnp.sum(loss_tile.reshape(tb // 8, 8, tn), axis=0)[None]


def _huber_psum_kernel(logits_ref, labels_ref, psum_ref, *, delta):
    """Per-batch-tile partial sums of the Huber loss (no elementwise output)."""
    j = pl.program_id(1)  # feature (reduction) axis — trailing, "arbitrary"

    @pl.when(j == 0)
    def _():
        psum_ref[...] = jnp.zeros_like(psum_ref)

    _accumulate_psum(_huber(logits_ref[...], labels_ref[...], delta), psum_ref)


def _huber_masked_psum_kernel(mask_ref, logits_ref, labels_ref, psum_ref, *,
                              delta):
    """Column-masked partial sums: mask_ref is a (1, tn) keep-weight row."""
    j = pl.program_id(1)

    @pl.when(j == 0)
    def _():
        psum_ref[...] = jnp.zeros_like(psum_ref)

    l = _huber(logits_ref[...], labels_ref[...], delta) * mask_ref[...]
    _accumulate_psum(l, psum_ref)


def _huber_elem_kernel(logits_ref, labels_ref, loss_ref, *, delta):
    """Element-wise Huber loss (reduction='none') tile, emitted in input dtype."""
    loss_ref[...] = _huber(logits_ref[...], labels_ref[...],
                           delta).astype(loss_ref.dtype)


# ----------------------------------------------------------------------------
# Tiling helpers
# ----------------------------------------------------------------------------
def _sublane_quantum(dtype):
    """Second-minor tiling quantum: 8 for f32, 16 for bf16, 32 for 1-byte."""
    return max(8, 32 // jnp.dtype(dtype).itemsize)


def _pick_tile(dim, preferred, quantum):
    """Largest divisor of `dim` that is <= preferred and a multiple of quantum."""
    assert dim % quantum == 0, f"dim {dim} must be a multiple of {quantum}"
    t = max(quantum, min(preferred, dim))
    t -= t % quantum
    while dim % t != 0:
        t -= quantum
    return t


def _pick_batch_tile(B, preferred, quantum):
    """Prefer >= 2 batch tiles so both v7x TensorCores get 'parallel' work."""
    if B >= 2 * quantum:
        preferred = min(preferred, B // 2)
    return _pick_tile(B, preferred, quantum)


def _vmem_limit_bytes(tb, tn, in_itemsize, n_big_inputs=2, out_tile_bytes=0):
    """Double-buffered working set + headroom, clamped to a safe range.

    >= 32 MiB so v5e's 16 MiB scoped default never rejects the larger tiles;
    <= 56 MiB so we stay well inside v7x's 64 MiB physical VMEM.
    """
    working = n_big_inputs * 2 * tb * tn * in_itemsize + 2 * out_tile_bytes
    return int(min(max(working + (4 << 20), 32 << 20), 56 << 20))


# ----------------------------------------------------------------------------
# Wrappers
# ----------------------------------------------------------------------------
def huber_loss_partial_sums(logits, labels, keep_weights=None, *, delta=1.0,
                            tile_b=512, tile_n=2048):
    """Per-batch-tile partial sums, shape (B//tb, 8, tn), f32.

    If `keep_weights` is given it must be a length-N f32 column weight vector
    (1.0 = keep, 0.0 = drop, >1.0 = repeated index); the sums are weighted.
    """
    B, N = logits.shape
    qb = _sublane_quantum(logits.dtype)
    tb = _pick_batch_tile(B, tile_b, qb)
    tn = _pick_tile(N, tile_n, 128)
    grid = (B // tb, N // tn)
    itemsize = jnp.dtype(logits.dtype).itemsize

    out_shape = jax.ShapeDtypeStruct((grid[0], 8, tn), jnp.float32)
    out_spec = pl.BlockSpec((1, 8, tn), lambda i, j: (i, 0, 0))
    big_spec = pl.BlockSpec((tb, tn), lambda i, j: (i, j))

    cost = pl.CostEstimate(
        flops=8 * B * N,
        transcendentals=0,
        bytes_accessed=2 * B * N * itemsize + grid[0] * 8 * tn * 4,
    )
    cparams = pltpu.CompilerParams(
        dimension_semantics=("parallel", "arbitrary"),
        vmem_limit_bytes=_vmem_limit_bytes(tb, tn, itemsize,
                                           out_tile_bytes=8 * tn * 4),
    )

    if keep_weights is None:
        kernel = functools.partial(_huber_psum_kernel, delta=delta)
        in_specs = [big_spec, big_spec]
        args = (logits, labels)
    else:
        kernel = functools.partial(_huber_masked_psum_kernel, delta=delta)
        in_specs = [pl.BlockSpec((1, tn), lambda i, j: (0, j)),
                    big_spec, big_spec]
        args = (keep_weights.reshape(1, N).astype(jnp.float32), logits, labels)

    return pl.pallas_call(
        kernel,
        out_shape=out_shape,
        grid_spec=pltpu.PrefetchScalarGridSpec(
            num_scalar_prefetch=0,
            grid=grid,
            in_specs=in_specs,
            out_specs=out_spec,
        ),
        compiler_params=cparams,
        cost_estimate=cost,
    )(*args)


def huber_loss_elementwise(logits, labels, *, delta=1.0,
                           tile_b=512, tile_n=2048):
    """Element-wise Huber loss (reduction='none'), shape (B, N), input dtype."""
    B, N = logits.shape
    qb = _sublane_quantum(logits.dtype)
    tb = _pick_batch_tile(B, tile_b, qb)
    tn = _pick_tile(N, tile_n, 128)
    grid = (B // tb, N // tn)
    itemsize = jnp.dtype(logits.dtype).itemsize

    cost = pl.CostEstimate(
        flops=8 * B * N,
        transcendentals=0,
        bytes_accessed=3 * B * N * itemsize,
    )
    cparams = pltpu.CompilerParams(
        dimension_semantics=("parallel", "parallel"),
        vmem_limit_bytes=_vmem_limit_bytes(tb, tn, itemsize,
                                           out_tile_bytes=tb * tn * itemsize),
    )

    kernel = functools.partial(_huber_elem_kernel, delta=delta)
    return pl.pallas_call(
        kernel,
        out_shape=jax.ShapeDtypeStruct((B, N), logits.dtype),
        grid_spec=pltpu.PrefetchScalarGridSpec(
            num_scalar_prefetch=0,
            grid=grid,
            in_specs=[pl.BlockSpec((tb, tn), lambda i, j: (i, j)),
                      pl.BlockSpec((tb, tn), lambda i, j: (i, j))],
            out_specs=pl.BlockSpec((tb, tn), lambda i, j: (i, j)),
        ),
        compiler_params=cparams,
        cost_estimate=cost,
    )(logits, labels)


def calculate_loss(batch_logits, batch_labels, *, delta=1.0, ignore_mask=None,
                   use_aux=False):
    """JAX equivalent of BaseModel.calculate_loss (eval path, use_aux=False).

    `ignore_mask` matches PyTorch `loss[:, self.ignore_mask]` semantics: a
    boolean keep-mask over columns, or an integer column-index array (repeated
    indices are weighted like the PyTorch gather would count them).
    """
    B, N = batch_logits.shape
    output = {"logits": batch_logits}

    if ignore_mask is not None:
        im = jnp.asarray(ignore_mask)
        if im.dtype == jnp.bool_:
            keep = im.astype(jnp.float32)
        else:
            keep = jnp.zeros((N,), jnp.float32).at[im].add(1.0)
        partials = huber_loss_partial_sums(batch_logits, batch_labels, keep,
                                           delta=delta)
        denom = jnp.float32(B) * jnp.sum(keep)
        loss = jnp.sum(partials) / denom
    else:
        partials = huber_loss_partial_sums(batch_logits, batch_labels,
                                           delta=delta)
        loss = jnp.sum(partials) / jnp.float32(batch_logits.size)

    # TODO(synk): forward() is abstract and the use_aux branch needs
    # self.aux_decoder, which BaseModel never defines — not implementable here.
    output["loss"] = loss
    return output


# ----------------------------------------------------------------------------
# Reference + self-test
# ----------------------------------------------------------------------------
def _reference_huber_elem(logits, labels, delta=1.0):
    r = logits - labels
    a = jnp.abs(r)
    return jnp.where(a <= delta, 0.5 * r * r, delta * (a - 0.5 * delta))


if __name__ == "__main__":
    key = jax.random.PRNGKey(0)
    k1, k2 = jax.random.split(key)
    B, N = 16, 256  # small; B multiple of 8 sublanes, N multiple of 128 lanes
    logits = jax.random.normal(k1, (B, N), dtype=jnp.float32) * 2.0
    labels = jax.random.normal(k2, (B, N), dtype=jnp.float32)

    ref_elem = _reference_huber_elem(logits, labels, 1.0)

    # Path 1: no ignore_mask, default (large) tiles.
    out = calculate_loss(logits, labels, delta=1.0)
    loss = jax.block_until_ready(out["loss"])
    ref = jnp.mean(ref_elem)
    assert jnp.allclose(loss, ref, rtol=1e-5, atol=1e-6), (loss, ref)

    # Path 1b: small tiles to exercise a multi-step (2, 2) grid + accumulation.
    p = huber_loss_partial_sums(logits, labels, delta=1.0, tile_b=8, tile_n=128)
    loss_small = jax.block_until_ready(jnp.sum(p) / jnp.float32(B * N))
    assert jnp.allclose(loss_small, ref, rtol=1e-5, atol=1e-6), (loss_small, ref)

    # Path 2: boolean keep-mask (fused masked partial-sum kernel).
    mask = (jnp.arange(N) % 3) == 0
    out2 = calculate_loss(logits, labels, delta=1.0, ignore_mask=mask)
    loss2 = jax.block_until_ready(out2["loss"])
    ref2 = jnp.mean(ref_elem[:, mask])
    assert jnp.allclose(loss2, ref2, rtol=1e-5, atol=1e-6), (loss2, ref2)

    # Path 2b: integer index mask (with a repeated index).
    idx = jnp.array([0, 5, 5, 100], dtype=jnp.int32)
    out3 = calculate_loss(logits, labels, delta=1.0, ignore_mask=idx)
    loss3 = jax.block_until_ready(out3["loss"])
    ref3 = jnp.mean(ref_elem[:, idx])
    assert jnp.allclose(loss3, ref3, rtol=1e-5, atol=1e-6), (loss3, ref3)

    # Path 3: bf16 inputs (dtype-aware sublane quantum, f32 accumulation).
    lb = logits.astype(jnp.bfloat16)
    yb = labels.astype(jnp.bfloat16)
    out4 = calculate_loss(lb, yb, delta=1.0)
    loss4 = jax.block_until_ready(out4["loss"])
    ref4 = jnp.mean(_reference_huber_elem(lb.astype(jnp.float32),
                                          yb.astype(jnp.float32), 1.0))
    assert jnp.allclose(loss4, ref4, rtol=1e-4, atol=1e-5), (loss4, ref4)

    # Utility: elementwise (reduction='none') kernel parity.
    le = jax.block_until_ready(huber_loss_elementwise(logits, labels, delta=1.0))
    assert jnp.allclose(le, ref_elem, rtol=1e-5, atol=1e-6)

    print("KERNEL_OK")
</pallas_src>

<mosaic_0001>
module attributes {stable_mosaic.version = 11 : i64} {
  func.func @_huber_psum_kernel(%arg0: i32, %arg1: i32, %arg2: memref<8x256xf32, #tpu.memory_space<vmem>>, %arg3: memref<8x256xf32, #tpu.memory_space<vmem>>, %arg4: memref<1x8x256xf32, #tpu.memory_space<vmem>>) attributes {dimension_semantics = [#tpu.dimension_semantics<parallel>, #tpu.dimension_semantics<arbitrary>], iteration_bounds = array<i64: 2, 1>, scalar_prefetch = 0 : i64, scratch_operands = 0 : i64, tpu.core_type = #tpu.core_type<tc>, window_params = [{transform_indices = @transform_0, window_bounds = array<i64: 8, 256>}, {transform_indices = @transform_1, window_bounds = array<i64: 8, 256>}, {transform_indices = @transform_2, window_bounds = array<i64: 1, 8, 256>}]} {
    %c0_i32 = arith.constant 0 : i32
    %0 = arith.cmpi eq, %arg1, %c0_i32 : i32
    %1 = arith.extui %0 : i1 to i32
    %c0_i32_0 = arith.constant 0 : i32
    %2 = arith.cmpi ne, %1, %c0_i32_0 : i32
    scf.if %2 {
      %cst_12 = arith.constant 0.000000e+00 : f32
      %19 = vector.broadcast %cst_12 : f32 to vector<1x8x256xf32>
      %c0_13 = arith.constant 0 : index
      %c0_14 = arith.constant 0 : index
      %c0_15 = arith.constant 0 : index
      %20 = vector.load %arg4[%c0_13, %c0_14, %c0_15] : memref<1x8x256xf32, #tpu.memory_space<vmem>>, vector<1x8x256xf32>
      tpu.vector_store %arg4[%c0_13, %c0_14, %c0_15], %19 {strides = array<i32>} : memref<1x8x256xf32, #tpu.memory_space<vmem>>, vector<1x8x256xf32>,
    } else {
    }
    %c0 = arith.constant 0 : index
    %c0_1 = arith.constant 0 : index
    %3 = vector.load %arg2[%c0, %c0_1] : memref<8x256xf32, #tpu.memory_space<vmem>>, vector<8x256xf32>
    %c0_2 = arith.constant 0 : index
    %c0_3 = arith.constant 0 : index
    %4 = vector.load %arg3[%c0_2, %c0_3] : memref<8x256xf32, #tpu.memory_space<vmem>>, vector<8x256xf32>
    %5 = arith.subf %3, %4 : vector<8x256xf32>
    %6 = math.absf %5 : vector<8x256xf32>
    %cst = arith.constant 1.000000e+00 : f32
    %7 = vector.broadcast %cst : f32 to vector<8x256xf32>
    %8 = arith.minimumf %6, %7 : vector<8x256xf32>
    %cst_4 = arith.constant 5.000000e-01 : f32
    %9 = vector.broadcast %cst_4 : f32 to vector<8x256xf32>
    %10 = arith.mulf %9, %8 : vector<8x256xf32>
    %11 = arith.subf %6, %10 : vector<8x256xf32>
    %12 = arith.mulf %8, %11 : vector<8x256xf32>
    %c0_5 = arith.constant 0 : index
    %c0_6 = arith.constant 0 : index
    %c0_7 = arith.constant 0 : index
    %13 = vector.load %arg4[%c0_5, %c0_6, %c0_7] : memref<1x8x256xf32, #tpu.memory_space<vmem>>, vector<1x8x256xf32>
    %14 = vector.shape_cast %12 : vector<8x256xf32> to vector<1x8x256xf32>
    %cst_8 = arith.constant dense<0.000000e+00> : vector<8x256xf32>
    %15 = vector.multi_reduction <add>, %14, %cst_8 [0] : vector<1x8x256xf32> to vector<8x256xf32>
    %16 = vector.shape_cast %15 : vector<8x256xf32> to vector<1x8x256xf32>
    %17 = arith.addf %13, %16 : vector<1x8x256xf32>
    %c0_9 = arith.constant 0 : index
    %c0_10 = arith.constant 0 : index
    %c0_11 = arith.constant 0 : index
    %18 = vector.load %arg4[%c0_9, %c0_10, %c0_11] : memref<1x8x256xf32, #tpu.memory_space<vmem>>, vector<1x8x256xf32>
    tpu.vector_store %arg4[%c0_9, %c0_10, %c0_11], %17 {strides = array<i32>} : memref<1x8x256xf32, #tpu.memory_space<vmem>>, vector<1x8x256xf32>,
    return
  }
  func.func @transform_0(%arg0: i32, %arg1: i32) -> (i32, i32) {
    %c0_i32 = arith.constant 0 : i32
    return %arg0, %arg1 : i32, i32
  }
  func.func @transform_1(%arg0: i32, %arg1: i32) -> (i32, i32) {
    %c0_i32 = arith.constant 0 : i32
    return %arg0, %arg1 : i32, i32
  }
  func.func @transform_2(%arg0: i32, %arg1: i32) -> (i32, i32, i32) {
    %c0_i32 = arith.constant 0 : i32
    %c0_i32_0 = arith.constant 0 : i32
    %c0_i32_1 = arith.constant 0 : i32
    return %arg0, %c0_i32, %c0_i32_0 : i32, i32, i32
  }
}

</mosaic_0001>

<bundles_post_ra>
// kernel: tpu_custom_call.1
= control target key start
LH: loop header
LB: loop body
LE: loop exit
PB: predicated region body
PF: predicated region fallthrough
CT: control target
= control target key end

     0   :  { %7 = vsyncpa [#allocation3], 0  ;;  %s848_s0 = inlined_call_operand.hbm [shape: f32[16,256], index: 0, kind: input, shape index: {}]   ;;  %s849_s1 = inlined_call_operand.hbm [shape: f32[16,256], index: 1, kind: input, shape index: {}]   ;;  %s850_s2 = inlined_call_operand.hbm [shape: f32[2,8,256], index: 2, kind: output, shape index: {}]  }
   0x1   :  { %9 = vsyncpa [#allocation3 + $0x1], 0 }
   0x2   :  { %10 = vsyncpa [#allocation6], 0 }
   0x3   :  { %12 = vsyncpa [#allocation6 + $0x1], 0 }
   0x4   :  { %13 = vsyncpa [#allocation4], 0 }
   0x5   :  { %15 = vsyncpa [#allocation4 + $0x1], 0  ;;  %s628_s9 = smov 0   ;;  %s630_s10 = smov 0  }
   0x6   :  { %s632_s11 = smov 0   ;;  %s634_s12 = smov 0  }
   0x7   :  { %s636_s13 = smov 0   ;;  %s638_s14 = smov 0  }
   0x8 LB: > { %s372_s15 = sadd.s32 4294967295, %s608_s14   ;;  %s373_s16 = sadd.s32 4294967294, %s608_s14   ;;  %s608_s14 = sphi %s638_s14, %s21_s14   ;;  %s604_s13 = sphi %s636_s13, %s870_s13   ;;  %s600_s12 = sphi %s634_s12, %s869_s12   ;;  %s596_s11 = sphi %s632_s11, %s868_s11   ;;  %s592_s10 = sphi %s630_s10, %s867_s10   ;;  %s588_s9 = sphi %s628_s9, %s866_s9  }
   0x9   : > { %s33_s17 = sadd.s32 1, %s604_s13  ;;  %s42_s18 = sadd.s32 1, %s596_s11 }
   0xa   : > { %p35_p0 = scmp.ge.s32.totalorder %s33_s17, 2  ;;  %p49_p1 = scmp.ne.s32.totalorder %s596_s11, %s592_s10 }
   0xb   : > { %p50_p2 = scmp.eq.s32.totalorder %s608_s14, 0  ;;  %p55_p3 = scmp.ne.s32.totalorder %s592_s10, %s588_s9 }
   0xc   : > { %s872_s17 = smov (%p35_p0, %s33_s17), 0  ;;  %p56_p5 = scmp.eq.s32.totalorder %s372_s15, 0 }
   0xd   : > { %p669_p4 = por %p50_p2, %p49_p1  ;;  %s37_s20 = ssub.s32 %s604_s13, %s872_s17 }
   0xe   : > { %p107_p6 = scmp.eq.s32.totalorder %s372_s15, 1  ;;  %p40_p7 = scmp.eq.s32.totalorder %s37_s20, 0 }
   0xf   : > { %p675_p8 = por %p56_p5, %p55_p3  ;;  %p113_p10 = scmp.eq.s32.totalorder %s373_s16, 1 }
  0x10   : > { %p679_p9 = por %p107_p6, %p49_p1  ;;  %p411_p13 = scmp.lt.s32.totalorder %s608_s14, 2 }
  0x11   : > { %s854_s21 = scalar_select %p675_p8, 1, 0 }
  0x12   : > { %s855_s22 = scalar_select %p679_p9, 1, 0 }
  0x13   : > { %s684_s23 = scalar_select %p40_p7, %s596_s11, %s42_s18  }
  0x14   : > { %p686_p11 = por %p113_p10, %p55_p3  ;;  %s693_s25 = sand.u32 1, %s596_s11  }
  0x15   : > { %s376_s26 = sshll.u32 %s693_s25, 4  ;;  %s391_s27 = sshll.u32 %s604_s13, 8 }
  0x16   : > { %s856_s24 = scalar_select %p686_p11, 1, 0 }
  0x17   : > { %s702_s30 = scalar_lea.hbm %s848_s0, %s391_s27  ;;  %s137_s3 = scalar_lea.vmem [#allocation2], %s376_s26 }
  0x18   : > { %s147_s4 = sshll.u32 %s137_s3, 4  ;;  %p710_p0 = pnand %p411_p13, %p669_p4  ;;  %s706_s4 = int_to_ptr.vmem [resolvable:$true] %s147_s4 }
  0x19   : > { %s134_s6 = scalar_lea.sflag [#allocation3], %s693_s25  ;;  %s462_s7 = scalar_lea.hbm %s702_s30, 256 }
  0x1a   : > { %p463_p3 = scmp.ne.s32.totalorder %s702_s30, %s462_s7  ;;  %p464_p5 = pneg %p710_p0 }
  0x1b   : > { %s467_s16 = scalar_lea.hbm %s848_s0, 512  ;;  %p468_p4 = scmp.lt.u32.totalorder %s702_s30, %s848_s0 }
  0x1c   : > { %p465_p6 = pnand %p464_p5, %p463_p3  ;;  %p469_p10 = scmp.lt.u32.totalorder %s467_s16, %s462_s7 }
  0x1d   : > { %p471_p12 = scmp.lt.u32.totalorder %s462_s7, %s702_s30 }
  0x1e   : > { %p466_p7 = pneg %p465_p6  ;;  %p470_p13 = por %p469_p10, %p468_p4 }
  0x20   : > { %p472_p1 = por %p471_p12, %p470_p13 }
  0x22   : > { %p473_p2 = pnand %p472_p1, %p466_p7 }
  0x24   : > { %476 = shalt.err (!%p473_p2)
}
  0x25   : > { %s477_s20 = scalar_lea.vmem %s706_s4, 256  ;;  %s610_s28 = smov [#allocation2]  }
  0x26   : > { %p478_p3 = scmp.ne.s32.totalorder %s706_s4, %s477_s20  ;;  %s482_s29 = sshll.u32 %s610_s28, 4  ;;  %s483_s29 = int_to_ptr.vmem [resolvable:$false] %s482_s29 }
  0x27   : > { %s484_s3 = scalar_lea.vmem %s483_s29, 512  ;;  %p485_p9 = scmp.lt.s32.totalorder %s706_s4, %s483_s29 }
  0x28   : > { %p480_p6 = pnand %p478_p3, %p464_p5  ;;  %p486_p4 = scmp.lt.s32.totalorder %s484_s3, %s477_s20 }
  0x2a   : > { %p481_p11 = pneg %p480_p6  ;;  %p487_p10 = por %p486_p4, %p485_p9 }
  0x2c   : > { %p488_p12 = pnand %p487_p10, %p481_p11 }
  0x2e   : > { %491 = shalt.err (!%p488_p12)
}
  0x2f   : > { %403 = dma.hbm_to_vmem [thread:$0]  (!%p710_p0), %s702_s30, 256, %s706_s4, %s134_s6  }
  0x30   : > { %p858_p1 = scmp.lt.s32.totalorder %s608_s14, 3  ;;  %p859_p2 = scmp.ge.s32.totalorder %s608_s14, 1 }
  0x31   : > { %s755_s16 = scalar_lea.hbm %s849_s1, %s391_s27  ;;  %s158_s18 = scalar_lea.vmem [#allocation5], %s376_s26 }
  0x32   : > { %p746_p7 = pnand %p859_p2, %p858_p1  ;;  %s168_s19 = sshll.u32 %s158_s18, 4  ;;  %s169_s19 = int_to_ptr.vmem [resolvable:$true] %s168_s19 }
  0x33   : > { %s155_s30 = scalar_lea.sflag [#allocation6], %s693_s25  ;;  %s492_s4 = scalar_lea.hbm %s755_s16, 256 }
  0x34   : > { %s860_s7 = scalar_select %p746_p7, 1, 0 }
  0x35   : > { %p493_p9 = scmp.ne.s32.totalorder %s755_s16, %s492_s4  ;;  %s497_s27 = scalar_lea.hbm %s849_s1, 512 }
  0x36   : > { %p498_p3 = scmp.lt.u32.totalorder %s755_s16, %s849_s1  ;;  %p499_p6 = scmp.lt.u32.totalorder %s497_s27, %s492_s4 }
  0x37   : > { %p495_p11 = pnand %p493_p9, %p464_p5  ;;  %p501_p10 = scmp.lt.u32.totalorder %s492_s4, %s755_s16 }
  0x38   : > { %p500_p4 = por %p499_p6, %p498_p3 }
  0x39   : > { %p496_p13 = pneg %p495_p11 }
  0x3a   : > { %p502_p12 = por %p501_p10, %p500_p4 }
  0x3c   : > { %p503_p1 = pnand %p502_p12, %p496_p13 }
  0x3e   : > { %506 = shalt.err (!%p503_p1)
}
  0x3f   : > { %s507_s25 = scalar_lea.vmem %s169_s19, 256  ;;  %s611_s26 = smov [#allocation5]  }
  0x40   : > { %p508_p2 = scmp.ne.s32.totalorder %s169_s19, %s507_s25  ;;  %s512_s3 = sshll.u32 %s611_s26, 4  ;;  %s513_s3 = int_to_ptr.vmem [resolvable:$false] %s512_s3 }
  0x41   : > { %s514_s8 = scalar_lea.vmem %s513_s3, 512  ;;  %p515_p8 = scmp.lt.s32.totalorder %s169_s19, %s513_s3 }
  0x42   : > { %p510_p9 = pnand %p508_p2, %p464_p5  ;;  %p516_p7 = scmp.lt.s32.totalorder %s514_s8, %s507_s25 }
  0x44   : > { %p511_p11 = pneg %p510_p9  ;;  %p517_p3 = por %p516_p7, %p515_p8 }
  0x46   : > { %p518_p6 = pnand %p517_p3, %p511_p11 }
  0x48   : > { %521 = shalt.err (!%p518_p6)
}
  0x49   : > { %406 = dma.hbm_to_vmem [thread:$0]  (!%p710_p0), %s755_s16, 256, %s169_s19, %s155_s30  }
  0x4a   : > { %p861_p13 = scmp.ne.s32.totalorder %s860_s7, 0 }
  0x4b   : > { %s782_s15 = sand.u32 (!%p861_p13), 1, %s592_s10   ;;  %p862_p5 = scmp.ne.s32.totalorder (!%p861_p13), %s854_s21, 0 }
  0x4c   : > { %177 = sbr.rel (%p861_p13) target bundleno = 114 (0x72), region = 28  ;;  %s383_s18 = sshll.u32 (!%p861_p13), %s782_s15, 4 }
  0x4d   : > { %s180_s4 = scalar_lea.sflag (!%p861_p13), [#allocation3], %s782_s15  ;;  %s183_s6 = scalar_lea.vmem (!%p861_p13), [#allocation2], %s383_s18 }
  0x53   : > { %575 = dma.done.wait (%p862_p5), %s180_s4, 256  }
  0x54   : > { %577 = vsyncadd (%p862_p5), %s180_s4, 4294967040  ;;  %s189_s5 = scalar_lea.sflag [#allocation6], %s782_s15  ;;  %s192_s16 = scalar_lea.vmem [#allocation5], %s383_s18 }
  0x55   : > { %579 = dma.done.wait (%p862_p5), %s189_s5, 256  }
  0x56   : > { %581 = vsyncadd (%p862_p5), %s189_s5, 4294967040  ;;  %v226_v0 = vld [vmem:[%s183_s6] sm:$0xff]  ;;  %v227_v2 = vld [vmem:[%s183_s6 + $0x8] sm:$0xff]  ;;  %s393_s21 = sshll.u32 %s600_s12, 8  ;;  %s217_s7 = scalar_lea.vmem [#allocation7], %s383_s18 }
  0x57   : > { %v228_v1 = vld [vmem:[%s192_s16] sm:$0xff]  ;;  %v229_v4 = vld [vmem:[%s192_s16 + $0x8] sm:$0xff]  ;;  %s265_s19 = sshll.u32 %s217_s7, 4  ;;  %s799_s27 = scalar_lea.hbm %s850_s2, %s393_s21  ;;  %s801_s19 = int_to_ptr.vmem [resolvable:$true] %s265_s19 }
  0x58   : > { %v230_v3 = vsub.f32 %v226_v0, %v228_v1  ;;  %v231_v5 = vsub.f32 %v227_v2, %v229_v4  ;;  %s251_s28 = scalar_lea.sflag [#allocation4], %s782_s15  ;;  %s522_s29 = scalar_lea.vmem %s801_s19, 256 }
  0x59   : > { %p523_p8 = scmp.ne.s32.totalorder %s801_s19, %s522_s29  ;;  %p863_p0 = scmp.ne.s32.totalorder %s855_s22, 0 }
  0x5a   : > { %v232_v6 = vand.u32 2147483647, %v230_v3  ;;  %v233_v7 = vand.u32 2147483647, %v231_v5  ;;  %s612_s12 = smov [#allocation7]  }
  0x5b   : > { %p524_p7 = pnand %p523_p8, %p863_p0  ;;  %s526_s25 = sshll.u32 %s612_s12, 4  ;;  %s527_s25 = int_to_ptr.vmem [resolvable:$false] %s526_s25 }
  0x5c   : > { %v234_v8 = vmin.f32 %v232_v6, 1.0  ;;  %v235_v9 = vmin.f32 %v233_v7, 1.0  ;;  %s528_s26 = scalar_lea.vmem %s527_s25, 512  ;;  %p529_p10 = scmp.lt.s32.totalorder %s801_s19, %s527_s25 }
  0x5d   : > { %p525_p4 = pneg %p524_p7  ;;  %p530_p12 = scmp.lt.s32.totalorder %s528_s26, %s522_s29 }
  0x5e   : > { %v236_v10 = vmul.f32 0.5, %v234_v8  ;;  %v237_v11 = vmul.f32 0.5, %v235_v9 }
  0x5f   : > { %p531_p1 = por %p530_p12, %p529_p10 }
  0x60   : > { %v238_v12 = vsub.f32 %v232_v6, %v236_v10  ;;  %v239_v13 = vsub.f32 %v233_v7, %v237_v11 }
  0x61   : > { %p532_p2 = pnand %p531_p1, %p525_p4 }
  0x62   : > { %v240_v14 = vmul.f32 %v238_v12, %v234_v8  ;;  %v241_v15 = vmul.f32 %v239_v13, %v235_v9 }
  0x64   : > { %248 = vst [vmem:[%s217_s7] sm:$0xff] %v240_v14  ;;  %249 = vst [vmem:[%s217_s7 + $0x8] sm:$0xff] %v241_v15 }
  0x65   : > { %535 = shalt.err (!%p532_p2)
}
  0x66   : > { %s536_s3 = scalar_lea.hbm %s799_s27, 256  ;;  %s540_s18 = scalar_lea.hbm %s850_s2, 512 }
  0x67   : > { %p537_p9 = scmp.ne.s32.totalorder %s799_s27, %s536_s3  ;;  %p541_p6 = scmp.lt.u32.totalorder %s799_s27, %s850_s2 }
  0x68   : > { %p542_p13 = scmp.lt.u32.totalorder %s540_s18, %s536_s3  ;;  %p544_p8 = scmp.lt.u32.totalorder %s536_s3, %s799_s27 }
  0x69   : > { %p538_p11 = pnand %p537_p9, %p863_p0 }
  0x6a   : > { %p543_p5 = por %p542_p13, %p541_p6 }
  0x6b   : > { %p539_p3 = pneg %p538_p11 }
  0x6c   : > { %p545_p7 = por %p544_p8, %p543_p5 }
  0x6e   : > { %p546_p4 = pnand %p545_p7, %p539_p3 }
  0x70   : > { %549 = shalt.err (!%p546_p4)
}
  0x71   : > { %398 = dma.vmem_to_hbm [thread:$0]  (%p863_p0), %s801_s19, 256, %s799_s27, %s251_s28  }
  0x72 PF: > { %s277_s5 = sand.u32 1, %s588_s9   ;;  %p864_p10 = scmp.ne.s32.totalorder %s856_s24, 0 }
  0x73   : > { %p865_p12 = scmp.ge.s32.totalorder %s608_s14, 2  ;;  %s278_s16 = scalar_lea.sflag [#allocation4], %s277_s5 }
  0x75   : > { %p408_p1 = pnand %p865_p12, %p864_p10 }
  0x77   : > { %583 = dma.done.wait (!%p408_p1), %s278_s16, 256  }
  0x78   : > { %585 = vsyncadd (!%p408_p1), %s278_s16, 4294967040  ;;  %s21_s14 = sadd.s32 1, %s608_s14   ;;  %s866_s9 = smov %s592_s10 }
  0x79   : > { %p18_p2 = scmp.ge.s32.totalorder %s21_s14, 4   ;;  %s867_s10 = smov %s596_s11 }
  0x7a   : > { %s868_s11 = smov %s684_s23  ;;  %s869_s12 = smov %s604_s13 }
  0x7b   : > { %s870_s13 = smov %s872_s17  ;;  %20 = sbr.rel (!%p18_p2) target bundleno = 8 (0x8), region = 90 }
  0x82   :  { %283 = vsyncpa [#allocation3], 1 }
  0x83   :  { %285 = vsyncpa [#allocation3 + $0x1], 1 }
  0x84   :  { %286 = vsyncpa [#allocation6], 1 }
  0x85   :  { %288 = vsyncpa [#allocation6 + $0x1], 1 }
  0x86   :  { %289 = vsyncpa [#allocation4], 1 }
  0x87   :  { %291 = vsyncpa [#allocation4 + $0x1], 1 }

</bundles_post_ra>
